<compile_context>
chip_gen: v7x
topology: tpu7x:2x2x1
jax: 0.10.0
libtpu: 0.0.40
codegen_flags: <defaults>
</compile_context>

<pallas_src>
import functools

import jax
import jax.numpy as jnp
from jax import lax
from jax.experimental import pallas as pl
from jax.experimental.pallas import tpu as pltpu


def _round_up(x, m):
    return ((x + m - 1) // m) * m


_MASK_VALUE = -2.4e38   # large finite negative: masked logits (no inf/NaN math)
_M_INIT = -1e30         # running-max init; > _MASK_VALUE so empty rows stay safe


# ----------------- kernel 1: fused per-layer projection ----------------------

def _gat_proj_kernel(h_ref, w_ref, wdst_ref, wsrcT_ref, z_ref, sdst_ref, ssrcT_ref):
    """Per node-tile: z (all heads), s_dst, s_srcT in three MXU matmuls.

    h_ref:     (Tm, Din)    node features (bf16)
    w_ref:     (Din, HDpad) stacked per-head fc weights (bf16, zero padded)
    wdst_ref:  (Din, H)     column h = W_h @ a_dst_h (bf16)
    wsrcT_ref: (H, Din)     row    h = W_h @ a_src_h (bf16)
    z_ref:     (Tm, HDpad)  bf16  projected features, all heads concatenated
    sdst_ref:  (Tm, H)      f32   s_dst[j,h] = h_j . (W_h a_dst_h)
    ssrcT_ref: (H, Tm)      f32   s_src with nodes on LANES (for broadcast-add)
    """
    h = h_ref[...]
    z_ref[...] = jnp.dot(h, w_ref[...],
                         preferred_element_type=jnp.float32).astype(z_ref.dtype)
    sdst_ref[...] = jnp.dot(h, wdst_ref[...], preferred_element_type=jnp.float32)
    ssrcT_ref[...] = lax.dot_general(wsrcT_ref[...], h,
                                     (((1,), (1,)), ((), ())),
                                     preferred_element_type=jnp.float32)


def gat_project(h, w_stack, w_dst, w_srcT, *, tile_m=128):
    n_pad, din_pad = h.shape
    hd_pad = w_stack.shape[1]
    heads = w_dst.shape[1]
    assert n_pad % tile_m == 0
    gm = n_pad // tile_m
    return pl.pallas_call(
        _gat_proj_kernel,
        out_shape=(jax.ShapeDtypeStruct((n_pad, hd_pad), jnp.bfloat16),
                   jax.ShapeDtypeStruct((n_pad, heads), jnp.float32),
                   jax.ShapeDtypeStruct((heads, n_pad), jnp.float32)),
        grid_spec=pltpu.PrefetchScalarGridSpec(
            num_scalar_prefetch=0,
            grid=(gm,),
            in_specs=[
                pl.BlockSpec((tile_m, din_pad), lambda i: (i, 0)),   # h tile
                pl.BlockSpec((din_pad, hd_pad), lambda i: (0, 0)),   # W stack
                pl.BlockSpec((din_pad, heads), lambda i: (0, 0)),    # W a_dst
                pl.BlockSpec((heads, din_pad), lambda i: (0, 0)),    # (W a_src)^T
            ],
            out_specs=[
                pl.BlockSpec((tile_m, hd_pad), lambda i: (i, 0)),
                pl.BlockSpec((tile_m, heads), lambda i: (i, 0)),
                pl.BlockSpec((heads, tile_m), lambda i: (0, i)),
            ]),
        compiler_params=pltpu.CompilerParams(
            dimension_semantics=("parallel",),
            vmem_limit_bytes=32 * 1024 * 1024),
    )(h, w_stack, w_dst, w_srcT)


# -------------- kernel 2: flash-style masked-softmax aggregation -------------

def _gat_flash_kernel(sdst_ref, ssrcT_ref, z_ref, adj_ref, out_ref,
                      m_ref, l_ref, acc_ref, *, num_heads, head_dim, apply_elu):
    """Online (streaming) softmax over incoming edges + weighted aggregation.

    sdst_ref:  (Tq, H)      f32   dst attention term for this dst tile
    ssrcT_ref: (H, Tk)      f32   src attention term, src nodes on lanes
    z_ref:     (Tk, HDpad)  bf16  projected src features (all heads)
    adj_ref:   (Tq, Tk)     int8  adj[j, i] = 1 iff edge i -> j
    out_ref:   (Tq, HDpad)        concatenated head outputs (lane dense)
    m/l:       (Tq, H)      f32   running max / denom, heads on lanes
    acc:       (Tq, HDpad)  f32   un-normalized accumulator, output layout
    """
    ki = pl.program_id(1)
    tq, hd_pad = out_ref.shape
    hd_tot = num_heads * head_dim

    @pl.when(ki == 0)
    def _init():
        m_ref[...] = jnp.full(m_ref.shape, _M_INIT, dtype=jnp.float32)
        l_ref[...] = jnp.zeros(l_ref.shape, dtype=jnp.float32)
        acc_ref[...] = jnp.zeros(acc_ref.shape, dtype=jnp.float32)

    edge = adj_ref[...] != 0                                        # (Tq, Tk)

    for h in range(num_heads):                                      # static unroll
        lo = h * head_dim
        # e[j, i] = leaky_relu(a_dst_h.z_j + a_src_h.z_i)   (torch slope 0.01)
        e = sdst_ref[:, h:h + 1] + ssrcT_ref[h:h + 1, :]            # (Tq, Tk)
        e = jnp.maximum(e, 0.01 * e)
        # Single masking op; masked entries get a huge negative so the
        # stability max is a MASKED max (correctness fix) and exp() -> 0.
        e = jnp.where(edge, e, _MASK_VALUE)

        m_prev = m_ref[:, h:h + 1]                                  # (Tq, 1)
        m_new = jnp.maximum(m_prev, jnp.max(e, axis=-1, keepdims=True))
        corr = jnp.exp(m_prev - m_new)
        p = jnp.exp(e - m_new)                                      # masked -> 0
        l_ref[:, h:h + 1] = corr * l_ref[:, h:h + 1] + jnp.sum(
            p, axis=-1, keepdims=True)
        m_ref[:, h:h + 1] = m_new
        # Un-normalized aggregation for this head (bf16 MXU, f32 accumulate).
        acc_ref[:, lo:lo + head_dim] = corr * acc_ref[:, lo:lo + head_dim] + jnp.dot(
            p.astype(z_ref.dtype), z_ref[:, lo:lo + head_dim],
            preferred_element_type=jnp.float32)

    @pl.when(ki == pl.num_programs(1) - 1)
    def _finalize():
        pieces = []
        for h in range(num_heads):
            lo = h * head_dim
            # Deferred normalization; isolated / padded rows -> 0 output.
            inv = pl.reciprocal(jnp.maximum(l_ref[:, h:h + 1], 1e-30), approx=True)
            pieces.append(acc_ref[:, lo:lo + head_dim] * inv)
        if hd_pad > hd_tot:
            pieces.append(jnp.zeros((tq, hd_pad - hd_tot), dtype=jnp.float32))
        out = jnp.concatenate(pieces, axis=-1) if len(pieces) > 1 else pieces[0]
        if apply_elu:                                   # fused F.elu (non-final)
            out = jnp.where(out > 0, out, jnp.exp(out) - 1.0)
        out_ref[...] = out.astype(out_ref.dtype)        # full-width lane-dense store


def gat_aggregate(s_dst, s_srcT, z, adj, *, num_heads, head_dim, apply_elu,
                  tile_q=128, tile_k=128):
    n_pad, hd_pad = z.shape
    assert n_pad % tile_q == 0 and n_pad % tile_k == 0
    gq, gk = n_pad // tile_q, n_pad // tile_k
    out_dtype = jnp.bfloat16 if apply_elu else jnp.float32

    kernel = functools.partial(_gat_flash_kernel, num_heads=num_heads,
                               head_dim=head_dim, apply_elu=apply_elu)

    # Advisory cost hint: adjacency once, z re-streamed per dst tile,
    # constant-index s_dst once, s_srcT per dst tile.
    flops = int(gq * gk * num_heads * tile_q * tile_k * (8 + 2 * head_dim))
    transcendentals = int(gq * gk * num_heads * tile_q * tile_k)
    bytes_accessed = int(
        n_pad * n_pad * adj.dtype.itemsize
        + gq * n_pad * hd_pad * z.dtype.itemsize
        + n_pad * num_heads * 4
        + gq * num_heads * n_pad * 4
        + n_pad * hd_pad * jnp.dtype(out_dtype).itemsize)

    return pl.pallas_call(
        kernel,
        out_shape=jax.ShapeDtypeStruct((n_pad, hd_pad), out_dtype),
        grid_spec=pltpu.PrefetchScalarGridSpec(
            num_scalar_prefetch=0,
            grid=(gq, gk),
            in_specs=[
                pl.BlockSpec((tile_q, num_heads), lambda qi, ki: (qi, 0)),  # s_dst
                pl.BlockSpec((num_heads, tile_k), lambda qi, ki: (0, ki)),  # s_srcT
                pl.BlockSpec((tile_k, hd_pad), lambda qi, ki: (ki, 0)),     # z tile
                pl.BlockSpec((tile_q, tile_k), lambda qi, ki: (qi, ki)),    # adj tile
            ],
            out_specs=pl.BlockSpec((tile_q, hd_pad), lambda qi, ki: (qi, 0)),
            scratch_shapes=[
                pltpu.VMEM((tile_q, num_heads), jnp.float32),   # running max
                pltpu.VMEM((tile_q, num_heads), jnp.float32),   # running denom
                pltpu.VMEM((tile_q, hd_pad), jnp.float32),      # accumulator
            ]),
        compiler_params=pltpu.CompilerParams(
            dimension_semantics=("parallel", "arbitrary"),
            vmem_limit_bytes=32 * 1024 * 1024),
        cost_estimate=pl.CostEstimate(flops=flops,
                                      transcendentals=transcendentals,
                                      bytes_accessed=bytes_accessed),
    )(s_dst, s_srcT, z, adj)


def gat_layer(h, w_stack, w_dst, w_srcT, adj, *, num_heads, head_dim,
              apply_elu, tile_q=128, tile_k=128):
    """One MultiHeadGATLayer (merge='cat'): hoisted projection + flash aggregation."""
    z, s_dst, s_srcT = gat_project(h, w_stack, w_dst, w_srcT, tile_m=tile_q)
    return gat_aggregate(s_dst, s_srcT, z, adj, num_heads=num_heads,
                         head_dim=head_dim, apply_elu=apply_elu,
                         tile_q=tile_q, tile_k=tile_k)


# ----------------------- parameter initialization ---------------------------

def _xavier_normal(key, shape, gain):
    # torch nn.init.xavier_normal_ on a (fan_out, fan_in) Linear weight
    fan_out, fan_in = shape
    std = gain * (2.0 / (fan_in + fan_out)) ** 0.5
    return std * jax.random.normal(key, shape, dtype=jnp.float32)


def init_gat_params(key, in_dim, hidden_dim, out_dim, num_heads, num_layers,
                    feat_pad=128):
    """Per MultiHeadGATLayer: stacked / attn-folded, zero-padded, bf16 weights."""
    gain = 2.0 ** 0.5                          # calculate_gain('relu')
    layer_dims = [(in_dim, hidden_dim, num_heads)]
    for _ in range(num_layers - 1):
        layer_dims.append((hidden_dim * num_heads, hidden_dim, num_heads))
    layer_dims.append((hidden_dim * num_heads, out_dim, 1))

    params = []
    for (din, dout, heads) in layer_dims:
        din_pad = _round_up(din, feat_pad)
        hd_pad = _round_up(heads * dout, feat_pad)
        w_stack = jnp.zeros((din_pad, hd_pad), jnp.float32)
        w_dst = jnp.zeros((din_pad, heads), jnp.float32)
        w_srcT = jnp.zeros((heads, din_pad), jnp.float32)
        for h in range(heads):
            key, k1, k2 = jax.random.split(key, 3)
            w = _xavier_normal(k1, (dout, din), gain)        # fc.weight (out,in)
            a = _xavier_normal(k2, (1, 2 * dout), gain)      # attn_fc.weight
            wj = w.T                                         # (din, dout)
            a_src, a_dst = a[0, :dout], a[0, dout:]          # cat([src, dst])
            w_stack = w_stack.at[:din, h * dout:(h + 1) * dout].set(wj)
            w_dst = w_dst.at[:din, h].set(wj @ a_dst)        # fold attn into W
            w_srcT = w_srcT.at[h, :din].set(wj @ a_src)
        params.append(dict(w_stack=w_stack.astype(jnp.bfloat16),
                           w_dst=w_dst.astype(jnp.bfloat16),
                           w_srcT=w_srcT.astype(jnp.bfloat16),
                           num_heads=heads, head_dim=dout))
    return params


# ----------------------------- GAT forward ----------------------------------

def gat_forward(features, adj, params, *, tile=128):
    """GAT.forward(nf, corrupt=False) with dense per-block adjacency."""
    n, in_dim = features.shape
    n_pad = _round_up(n, tile)
    din_pad0 = params[0]["w_stack"].shape[0]

    # Padded, lane-dense bf16 activations flow between layers; sliced once at end.
    h = jnp.zeros((n_pad, din_pad0), jnp.float32).at[:n, :in_dim].set(features)
    h = h.astype(jnp.bfloat16)
    adj_p = jnp.zeros((n_pad, n_pad), jnp.int8).at[:n, :n].set(adj.astype(jnp.int8))

    out = None
    n_layers = len(params)
    for li, p in enumerate(params):
        apply_elu = li < n_layers - 1
        out = gat_layer(h, p["w_stack"], p["w_dst"], p["w_srcT"], adj_p,
                        num_heads=p["num_heads"], head_dim=p["head_dim"],
                        apply_elu=apply_elu, tile_q=tile, tile_k=tile)
        if apply_elu:
            # ELU fused into the kernel finalize; output already bf16.
            h = out
            # TODO(synk): nn.Dropout(0.5) applied as identity (eval mode).
    last = params[-1]
    return out[:n, :last["num_heads"] * last["head_dim"]]


# --------------------------- pure-JAX reference ------------------------------

def _gat_reference(features, adj, params):
    """Dense GAT forward in plain JAX (f32), mirroring the kernel's math."""
    adj_f = adj.astype(jnp.float32)
    h = features
    n_layers = len(params)
    out = None
    for li, p in enumerate(params):
        H, D = p["num_heads"], p["head_dim"]
        din = h.shape[1]
        w_stack = p["w_stack"][:din, :H * D].astype(jnp.float32)
        w_dst = p["w_dst"][:din, :].astype(jnp.float32)
        w_srcT = p["w_srcT"][:, :din].astype(jnp.float32)
        hh = h.astype(jnp.bfloat16).astype(jnp.float32)
        z = hh @ w_stack
        s_dst = hh @ w_dst
        s_src = hh @ w_srcT.T
        outs = []
        for hd in range(H):
            e = s_dst[:, hd:hd + 1] + s_src[:, hd][None, :]
            e = jnp.where(e > 0, e, 0.01 * e)
            e = jnp.where(adj_f > 0, e, -jnp.inf)
            alpha = jax.nn.softmax(e, axis=-1)
            outs.append(alpha @ z[:, hd * D:(hd + 1) * D])
        out = jnp.concatenate(outs, axis=1)
        if li < n_layers - 1:
            h = jax.nn.elu(out)
    return out


# --------------------------------- main --------------------------------------

if __name__ == "__main__":
    key = jax.random.PRNGKey(0)

    # small shapes consistent with GAT(in_dim, hidden_dim, out_dim, num_heads)
    N = 16          # nodes per NodeFlow layer
    IN_DIM = 8
    HIDDEN = 8
    OUT_DIM = 4
    NUM_HEADS = 2
    NUM_LAYERS = 2  # -> 3 MultiHeadGATLayers total

    key, kf, kp = jax.random.split(key, 3)
    features = jax.random.normal(kf, (N, IN_DIM), dtype=jnp.float32)

    # deterministic graph: ring + self-loops (every dst has >=1 in-edge)
    idx = jnp.arange(N)
    adj = ((idx[:, None] == idx[None, :])
           | (idx[:, None] == (idx[None, :] + 1) % N)
           | ((idx[:, None] + 1) % N == idx[None, :])).astype(jnp.int8)

    params = init_gat_params(kp, IN_DIM, HIDDEN, OUT_DIM, NUM_HEADS, NUM_LAYERS)

    out = gat_forward(features, adj, params)
    out = jax.block_until_ready(out)
    assert out.shape == (N, OUT_DIM), out.shape
    assert jnp.all(jnp.isfinite(out))

    ref = _gat_reference(features, adj, params)
    assert jnp.allclose(out, ref, rtol=5e-2, atol=1e-2), (out, ref)

    print("KERNEL_OK")
</pallas_src>

<mosaic_0001>
module attributes {stable_mosaic.version = 11 : i64} {
  func.func @_gat_proj_kernel(%arg0: i32, %arg1: memref<128x128xbf16, #tpu.memory_space<vmem>>, %arg2: memref<128x128xbf16, #tpu.memory_space<vmem>>, %arg3: memref<128x2xbf16, #tpu.memory_space<vmem>>, %arg4: memref<2x128xbf16, #tpu.memory_space<vmem>>, %arg5: memref<128x128xbf16, #tpu.memory_space<vmem>>, %arg6: memref<128x2xf32, #tpu.memory_space<vmem>>, %arg7: memref<2x128xf32, #tpu.memory_space<vmem>>) attributes {dimension_semantics = [#tpu.dimension_semantics<parallel>], iteration_bounds = array<i64: 1>, scalar_prefetch = 0 : i64, scratch_operands = 0 : i64, tpu.core_type = #tpu.core_type<tc>, window_params = [{transform_indices = @transform_0, window_bounds = array<i64: 128, 128>}, {pipeline_mode = #tpu.pipeline_mode<synchronous>, transform_indices = @transform_1, window_bounds = array<i64: 128, 128>}, {pipeline_mode = #tpu.pipeline_mode<synchronous>, transform_indices = @transform_2, window_bounds = array<i64: 128, 2>}, {pipeline_mode = #tpu.pipeline_mode<synchronous>, transform_indices = @transform_3, window_bounds = array<i64: 2, 128>}, {transform_indices = @transform_4, window_bounds = array<i64: 128, 128>}, {transform_indices = @transform_5, window_bounds = array<i64: 128, 2>}, {transform_indices = @transform_6, window_bounds = array<i64: 2, 128>}]} {
    %c0 = arith.constant 0 : index
    %c0_0 = arith.constant 0 : index
    %0 = vector.load %arg1[%c0, %c0_0] : memref<128x128xbf16, #tpu.memory_space<vmem>>, vector<128x128xbf16>
    %c0_1 = arith.constant 0 : index
    %c0_2 = arith.constant 0 : index
    %1 = vector.load %arg2[%c0_1, %c0_2] : memref<128x128xbf16, #tpu.memory_space<vmem>>, vector<128x128xbf16>
    %cst = arith.constant dense<0.000000e+00> : vector<128x128xf32>
    %2 = tpu.matmul %0, %1, %cst {dimension_numbers = #tpu.dot_dimension_numbers<[1], [0], [0], [1], [0, 0, 1, 1], [], []>} : vector<128x128xbf16>, vector<128x128xbf16>, vector<128x128xf32> -> vector<128x128xf32>
    %3 = arith.truncf %2 : vector<128x128xf32> to vector<128x128xbf16>
    %c0_3 = arith.constant 0 : index
    %c0_4 = arith.constant 0 : index
    %4 = vector.load %arg5[%c0_3, %c0_4] : memref<128x128xbf16, #tpu.memory_space<vmem>>, vector<128x128xbf16>
    tpu.vector_store %arg5[%c0_3, %c0_4], %3 {strides = array<i32>} : memref<128x128xbf16, #tpu.memory_space<vmem>>, vector<128x128xbf16>,
    %c0_5 = arith.constant 0 : index
    %c0_6 = arith.constant 0 : index
    %5 = vector.load %arg3[%c0_5, %c0_6] : memref<128x2xbf16, #tpu.memory_space<vmem>>, vector<128x2xbf16>
    %cst_7 = arith.constant dense<0.000000e+00> : vector<128x2xf32>
    %6 = tpu.matmul %0, %5, %cst_7 {dimension_numbers = #tpu.dot_dimension_numbers<[1], [0], [0], [1], [0, 0, 1, 1], [], []>} : vector<128x128xbf16>, vector<128x2xbf16>, vector<128x2xf32> -> vector<128x2xf32>
    %c0_8 = arith.constant 0 : index
    %c0_9 = arith.constant 0 : index
    %7 = vector.load %arg6[%c0_8, %c0_9] : memref<128x2xf32, #tpu.memory_space<vmem>>, vector<128x2xf32>
    tpu.vector_store %arg6[%c0_8, %c0_9], %6 {strides = array<i32>} : memref<128x2xf32, #tpu.memory_space<vmem>>, vector<128x2xf32>,
    %c0_10 = arith.constant 0 : index
    %c0_11 = arith.constant 0 : index
    %8 = vector.load %arg4[%c0_10, %c0_11] : memref<2x128xbf16, #tpu.memory_space<vmem>>, vector<2x128xbf16>
    %cst_12 = arith.constant dense<0.000000e+00> : vector<2x128xf32>
    %9 = tpu.matmul %8, %0, %cst_12 {dimension_numbers = #tpu.dot_dimension_numbers<[1], [1], [0], [0], [0, 0, 1, 0], [], []>} : vector<2x128xbf16>, vector<128x128xbf16>, vector<2x128xf32> -> vector<2x128xf32>
    %c0_13 = arith.constant 0 : index
    %c0_14 = arith.constant 0 : index
    %10 = vector.load %arg7[%c0_13, %c0_14] : memref<2x128xf32, #tpu.memory_space<vmem>>, vector<2x128xf32>
    tpu.vector_store %arg7[%c0_13, %c0_14], %9 {strides = array<i32>} : memref<2x128xf32, #tpu.memory_space<vmem>>, vector<2x128xf32>,
    return
  }
  func.func @transform_0(%arg0: i32) -> (i32, i32) {
    %c0_i32 = arith.constant 0 : i32
    %c0_i32_0 = arith.constant 0 : i32
    return %arg0, %c0_i32 : i32, i32
  }
  func.func @transform_1(%arg0: i32) -> (i32, i32) {
    %c0_i32 = arith.constant 0 : i32
    %c0_i32_0 = arith.constant 0 : i32
    %c0_i32_1 = arith.constant 0 : i32
    return %c0_i32, %c0_i32_0 : i32, i32
  }
  func.func @transform_2(%arg0: i32) -> (i32, i32) {
    %c0_i32 = arith.constant 0 : i32
    %c0_i32_0 = arith.constant 0 : i32
    %c0_i32_1 = arith.constant 0 : i32
    return %c0_i32, %c0_i32_0 : i32, i32
  }
  func.func @transform_3(%arg0: i32) -> (i32, i32) {
    %c0_i32 = arith.constant 0 : i32
    %c0_i32_0 = arith.constant 0 : i32
    %c0_i32_1 = arith.constant 0 : i32
    return %c0_i32, %c0_i32_0 : i32, i32
  }
  func.func @transform_4(%arg0: i32) -> (i32, i32) {
    %c0_i32 = arith.constant 0 : i32
    %c0_i32_0 = arith.constant 0 : i32
    return %arg0, %c0_i32 : i32, i32
  }
  func.func @transform_5(%arg0: i32) -> (i32, i32) {
    %c0_i32 = arith.constant 0 : i32
    %c0_i32_0 = arith.constant 0 : i32
    return %arg0, %c0_i32 : i32, i32
  }
  func.func @transform_6(%arg0: i32) -> (i32, i32) {
    %c0_i32 = arith.constant 0 : i32
    %c0_i32_0 = arith.constant 0 : i32
    return %c0_i32, %arg0 : i32, i32
  }
}

</mosaic_0001>

<bundles_post_ra>
// kernel: tpu_custom_call.1
= control target key start
LH: loop header
LB: loop body
LE: loop exit
PB: predicated region body
PF: predicated region fallthrough
CT: control target
= control target key end

     0   :  { %12 = vsyncpa [#allocation3], 0  ;;  %s1146_s0 = inlined_call_operand.vmem [shape: bf16[128,128], index: 0, kind: input, shape index: {}]   ;;  %s1147_s1 = inlined_call_operand.hbm [shape: bf16[128,128], index: 1, kind: input, shape index: {}]   ;;  %s1148_s2 = inlined_call_operand.vmem [shape: bf16[128,2], index: 2, kind: input, shape index: {}]   ;;  %s1149_s3 = inlined_call_operand.vmem [shape: bf16[2,128], index: 3, kind: input, shape index: {}]   ;;  %s1150_s4 = inlined_call_operand.hbm [shape: bf16[128,128], index: 4, kind: output, shape index: {0}]   ;;  %s1151_s5 = inlined_call_operand.vmem [shape: f32[128,2], index: 5, kind: output, shape index: {1}]   ;;  %s1152_s6 = inlined_call_operand.hbm [shape: f32[2,128], index: 6, kind: output, shape index: {2}]  }
   0x1   :  { %13 = vsyncpa [#allocation4], 0 }
   0x2   :  { %14 = vsyncpa [#allocation7], 0  ;;  %s928_s21 = smov [#allocation2]   ;;  %s856_s25 = scalar_lea.hbm %s1147_s1, 1024 }
   0x3   :  { %s22_s22 = sshll.u32 %s928_s21, 4  ;;  %p857_p0 = scmp.ne.s32.totalorder %s1147_s1, %s856_s25  ;;  %s23_s22 = int_to_ptr.vmem [resolvable:$true] %s22_s22 }
   0x4   :  { %p860_p1 = scmp.lt.u32.totalorder %s856_s25, %s1147_s1 }
   0x6   :  { %p862_p2 = pnand %p860_p1, %p857_p0 }
   0x8   :  { %865 = shalt.err (!%p862_p2)
}
   0x9   :  { %s866_s30 = scalar_lea.vmem %s23_s22, 1024  ;;  %p871_p4 = scmp.lt.s32.totalorder %s23_s22, %s23_s22 }
   0xa   :  { %p867_p3 = scmp.ne.s32.totalorder %s23_s22, %s866_s30  ;;  %p872_p5 = scmp.lt.s32.totalorder %s866_s30, %s866_s30 }
   0xc   :  { %p873_p6 = por %p872_p5, %p871_p4 }
   0xe   :  { %p874_p7 = pnand %p873_p6, %p867_p3 }
  0x10   :  { %877 = shalt.err (!%p874_p7)
}
  0x11   :  { %s929_s7 = smov 64   ;;  %s930_s8 = smov 4  }
  0x12   :  { %28 = dma.hbm_to_vmem [thread:$0]  %s1147_s1, 1024, %s23_s22, [#allocation3], %s929_s7, %s929_s7, %s930_s8  }
  0x13   :  { %922 = dma.done.wait [#allocation3], 1024  }
  0x14   :  { %923 = vsyncadd [#allocation3], 4294966272  ;;  %v931_v0 = vmov 0.0   ;;  %vm932_vm0 = vmmov 0   ;;  %v832_v1 = vld [vmem:[#allocation2] sm:$0xff]   ;;  %v833_v2 = vld [vmem:[#allocation2 + $0x8] sm:$0xff]  }
  0x15   :  { %805 = vmatprep.subr.bf16.mxu0 %v931_v0  ;;  %821 = vmatprep.mubr.msk.bf16.mxu0 %vm932_vm0, %v931_v0  ;;  %v834_v3 = vld [vmem:[#allocation2 + $0x10] sm:$0xff]   ;;  %v990_v4 = vld [vmem:[%s1146_s0] sm:$0xff]   ;;  %v835_v5 = vld [vmem:[#allocation2 + $0x18] sm:$0xff]   ;;  %vm503_vm1 = vcmask 15360  }
  0x16   :  { %741 = vmatprep.subr.bf16.mxu1 %v832_v1  ;;  %806 = vmatpush3.bf16.xpose.msra.mxu0 %v990_v4  ;;  %v836_v6 = vld [vmem:[#allocation2 + $0x20] sm:$0xff]   ;;  %v998_v7 = vld [vmem:[%s1146_s0 + $0x8] sm:$0xff]   ;;  %v838_v9 = vld [vmem:[#allocation2 + $0x30] sm:$0xff]  }
  0x17   :  { %742 = vmatpush3.bf16.msra.mxu1 %v832_v1  ;;  %757 = vmatprep.mubr.bf16.mxu1 %v990_v4  ;;  %v837_v8 = vld [vmem:[#allocation2 + $0x28] sm:$0xff]   ;;  %v844_v10 = vld [vmem:[%s1146_s0 + $0x10] sm:$0xff]   ;;  %v840_v11 = vld [vmem:[#allocation2 + $0x38] sm:$0xff]  }
  0x18   :  { %743 = vmatprep.subr.bf16.mxu1 %v833_v2  ;;  %807 = vmatprep.subr.bf16.mxu0 %v931_v0  ;;  %v842_v12 = vld [vmem:[%s1148_s2] sm:$0xff]   ;;  %v845_v13 = vld [vmem:[%s1146_s0 + $0x18] sm:$0xff]   ;;  %v843_v14 = vld [vmem:[%s1148_s2 + $0x8] sm:$0xff]  }
  0x19   :  { %v846_v15 = vld [vmem:[%s1148_s2 + $0x10] sm:$0xff]   ;;  %v848_v16 = vld [vmem:[%s1146_s0 + $0x20] sm:$0xff]   ;;  %v847_v17 = vld [vmem:[%s1148_s2 + $0x18] sm:$0xff]  }
  0x1a   :  { %v850_v18 = vld [vmem:[%s1148_s2 + $0x20] sm:$0xff]   ;;  %v849_v19 = vld [vmem:[%s1146_s0 + $0x28] sm:$0xff]   ;;  %v852_v20 = vld [vmem:[%s1146_s0 + $0x30] sm:$0xff]  }
  0x1b   :  { %744 = vmatpush3.bf16.msra.mxu1 %v833_v2  ;;  %v851_v21 = vld [vmem:[%s1148_s2 + $0x28] sm:$0xff]   ;;  %v854_v22 = vld [vmem:[%s1148_s2 + $0x30] sm:$0xff]   ;;  %v853_v23 = vld [vmem:[%s1146_s0 + $0x38] sm:$0xff]  }
  0x1c   :  { %745 = vmatprep.subr.bf16.mxu1 %v834_v3  ;;  %v855_v24 = vld [vmem:[%s1148_s2 + $0x38] sm:$0xff]   ;;  %v520_v25 = vld [vmem:[%s1149_s3] sm:$0x1]  ;;  %s933_s2 = smov [#allocation5]  }
  0x1d   :  { %s567_s3 = sshll.u32 %s933_s2, 4  ;;  %s568_s3 = int_to_ptr.vmem [resolvable:$true] %s567_s3 }
  0x1e   :  { %808 = vmatpush3.bf16.xpose.msra.mxu0 %v998_v7  ;;  %s878_s20 = scalar_lea.vmem %s568_s3, 1024  ;;  %p883_p9 = scmp.lt.s32.totalorder %s568_s3, %s568_s3 }
  0x1f   :  { %746 = vmatpush3.bf16.msra.mxu1 %v834_v3  ;;  %809 = vmatprep.subr.bf16.mxu0 %v931_v0  ;;  %p879_p8 = scmp.ne.s32.totalorder %s568_s3, %s878_s20  ;;  %p884_p10 = scmp.lt.s32.totalorder %s878_s20, %s878_s20 }
  0x20   :  { %747 = vmatprep.subr.bf16.mxu1 %v835_v5 }
  0x21   :  { %p885_p11 = por %p884_p10, %p883_p9 }
  0x23   :  { %748 = vmatpush3.bf16.msra.mxu1 %v835_v5  ;;  %p886_p12 = pnand %p885_p11, %p879_p8 }
  0x24   :  { %749 = vmatprep.subr.bf16.mxu1 %v836_v6 }
  0x26   :  { %810 = vmatpush3.bf16.xpose.msra.mxu0 %v844_v10 }
  0x27   :  { %750 = vmatpush3.bf16.msra.mxu1 %v836_v6  ;;  %811 = vmatprep.subr.bf16.mxu0 %v931_v0 }
  0x28   :  { %751 = vmatprep.subr.bf16.mxu1 %v837_v8 }
  0x2b   :  { %752 = vmatpush3.bf16.msra.mxu1 %v837_v8 }
  0x2c   :  { %753 = vmatprep.subr.bf16.mxu1 %v838_v9 }
  0x2e   :  { %812 = vmatpush3.bf16.xpose.msra.mxu0 %v845_v13 }
  0x2f   :  { %754 = vmatpush3.bf16.msra.mxu1 %v838_v9  ;;  %813 = vmatprep.subr.bf16.mxu0 %v931_v0 }
  0x30   :  { %755 = vmatprep.subr.bf16.mxu1 %v840_v11 }
  0x33   :  { %756 = vmatpush3.bf16.msra.mxu1 %v840_v11 }
  0x34   :  { %773 = vmatprep.subr.bf16.mxu1 %v842_v12 }
  0x36   :  { %758 = vmatmul.mubr.bf16.vlgmr.msra.gmra.mrb[0].mxu1 %v998_v7  ;;  %814 = vmatpush3.bf16.xpose.msra.mxu0 %v848_v16 }
  0x37   :  { %774 = vmatpush3.bf16.msra.mxu1 %v842_v12  ;;  %761 = vmatprep.mubr.bf16.mxu1 %v844_v10 }
  0x38   :  { %775 = vmatprep.subr.bf16.mxu1 %v843_v14  ;;  %815 = vmatprep.subr.bf16.mxu0 %v931_v0 }
  0x3b   :  { %776 = vmatpush3.bf16.msra.mxu1 %v843_v14 }
  0x3c   :  { %777 = vmatprep.subr.bf16.mxu1 %v846_v15 }
  0x3e   :  { %762 = vmatmul.mubr.bf16.gmra.mrb[4].mxu1 %v845_v13  ;;  %816 = vmatpush3.bf16.xpose.msra.mxu0 %v849_v19 }
  0x3f   :  { %778 = vmatpush3.bf16.msra.mxu1 %v846_v15  ;;  %765 = vmatprep.mubr.bf16.mxu1 %v848_v16 }
  0x40   :  { %779 = vmatprep.subr.bf16.mxu1 %v847_v17  ;;  %817 = vmatprep.subr.bf16.mxu0 %v931_v0 }
  0x43   :  { %780 = vmatpush3.bf16.msra.mxu1 %v847_v17 }
  0x44   :  { %781 = vmatprep.subr.bf16.mxu1 %v850_v18 }
  0x46   :  { %766 = vmatmul.mubr.bf16.gmra.mrb[8].mxu1 %v849_v19  ;;  %818 = vmatpush3.bf16.xpose.msra.mxu0 %v852_v20 }
  0x47   :  { %782 = vmatpush3.bf16.msra.mxu1 %v850_v18  ;;  %769 = vmatprep.mubr.bf16.mxu1 %v852_v20 }
  0x48   :  { %783 = vmatprep.subr.bf16.mxu1 %v851_v21  ;;  %819 = vmatprep.subr.bf16.mxu0 %v931_v0 }
  0x4b   :  { %784 = vmatpush3.bf16.msra.mxu1 %v851_v21 }
  0x4c   :  { %785 = vmatprep.subr.bf16.mxu1 %v854_v22 }
  0x4e   :  { %770 = vmatmul.mubr.bf16.gmra.mrb[12].mxu1 %v853_v23  ;;  %820 = vmatpush3.bf16.xpose.msra.mxu0 %v853_v23 }
  0x4f   :  { %786 = vmatpush3.bf16.msra.mxu1 %v854_v22  ;;  %789 = vmatprep.mubr.bf16.mxu1 %v990_v4 }
  0x50   :  { %787 = vmatprep.subr.bf16.mxu1 %v855_v24 }
  0x53   :  { %788 = vmatpush3.bf16.msra.mxu1 %v855_v24 }
  0x55   :  { %822 = vmatmul.mubr.bf16.vlgmr.msra.gmra.mrb[0].mxu0 %v520_v25 }
  0x56   :  { %790 = vmatmul.mubr.bf16.vlgmr.msra.gmra.mrb[16].mxu1 %v998_v7 }
  0x57   :  { %793 = vmatprep.mubr.bf16.mxu1 %v844_v10 }
  0x5e   :  { %794 = vmatmul.mubr.bf16.gmra.mrb[20].mxu1 %v845_v13 }
  0x5f   :  { %797 = vmatprep.mubr.bf16.mxu1 %v848_v16 }
  0x66   :  { %798 = vmatmul.mubr.bf16.gmra.mrb[24].mxu1 %v849_v19 }
  0x67   :  { %801 = vmatprep.mubr.bf16.mxu1 %v852_v20 }
  0x6e   :  { %802 = vmatmul.mubr.bf16.gmra.mrb[28].mxu1 %v853_v23 }
 0x109   :  { %v759_v26 = vpop.f32.mrb[0].mxu1 }
 0x10a   :  { %v199_v27 = vpop.f32.mrb[1].mxu1 }
 0x10b   :  { %v760_v28 = vpop.f32.mrb[2].mxu1 }
 0x10c   :  { %v661_v29 = vpack.c.bf16 %v760_v28, %v759_v26  ;;  %v202_v30 = vpop.f32.mrb[3].mxu1 }
 0x10d   :  { %v656_v31 = vpack.c.bf16 %v202_v30, %v199_v27 }
 0x10e   :  { %693 = vst [vmem:[#allocation5 + $0x8] sm:$0xff] %v661_v29  }
 0x10f   :  { %657 = vst [vmem:[#allocation5] sm:$0xff] %v656_v31  }
 0x111   :  { %v763_v32 = vpop.f32.mrb[4].mxu1 }
 0x112   :  { %v215_v33 = vpop.f32.mrb[5].mxu1 }
 0x113   :  { %v764_v34 = vpop.f32.mrb[6].mxu1 }
 0x114   :  { %v671_v35 = vpack.c.bf16 %v764_v34, %v763_v32  ;;  %v218_v36 = vpop.f32.mrb[7].mxu1 }
 0x115   :  { %v666_v37 = vpack.c.bf16 %v218_v36, %v215_v33 }
 0x116   :  { %695 = vst [vmem:[#allocation5 + $0x18] sm:$0xff] %v671_v35  }
 0x117   :  { %694 = vst [vmem:[#allocation5 + $0x10] sm:$0xff] %v666_v37  }
 0x119   :  { %v767_v38 = vpop.f32.mrb[8].mxu1 }
 0x11a   :  { %v231_v39 = vpop.f32.mrb[9].mxu1 }
 0x11b   :  { %v768_v40 = vpop.f32.mrb[10].mxu1 }
 0x11c   :  { %v681_v41 = vpack.c.bf16 %v768_v40, %v767_v38  ;;  %v234_v42 = vpop.f32.mrb[11].mxu1 }
 0x11d   :  { %v676_v43 = vpack.c.bf16 %v234_v42, %v231_v39 }
 0x11e   :  { %697 = vst [vmem:[#allocation5 + $0x28] sm:$0xff] %v681_v41  }
 0x11f   :  { %696 = vst [vmem:[#allocation5 + $0x20] sm:$0xff] %v676_v43  }
 0x121   :  { %v771_v44 = vpop.f32.mrb[12].mxu1 }
 0x122   :  { %v247_v45 = vpop.f32.mrb[13].mxu1 }
 0x123   :  { %v772_v46 = vpop.f32.mrb[14].mxu1 }
 0x124   :  { %v691_v47 = vpack.c.bf16 %v772_v46, %v771_v44  ;;  %v250_v48 = vpop.f32.mrb[15].mxu1 }
 0x125   :  { %v686_v49 = vpack.c.bf16 %v250_v48, %v247_v45 }
 0x126   :  { %699 = vst [vmem:[#allocation5 + $0x38] sm:$0xff] %v691_v47  }
 0x127   :  { %698 = vst [vmem:[#allocation5 + $0x30] sm:$0xff] %v686_v49  }
 0x128   :  { %889 = shalt.err (!%p886_p12)
}
 0x129   :  { %s890_s23 = scalar_lea.hbm %s1150_s4, 1024 }
 0x12a   :  { %p891_p13 = scmp.ne.s32.totalorder %s1150_s4, %s890_s23  ;;  %p894_p0 = scmp.lt.u32.totalorder %s890_s23, %s1150_s4 }
 0x12c   :  { %p896_p1 = pnand %p894_p0, %p891_p13 }
 0x12e   :  { %899 = shalt.err (!%p896_p1)
}
 0x12f   :  { %573 = dma.vmem_to_hbm [thread:$0]  %s568_s3, 1024, %s1150_s4, [#allocation4], %s929_s7, %s929_s7, %s930_s8   ;;  %v791_v50 = vpop.f32.mrb[16].mxu1  ;;  %v555_v54 = vpop.f32.mrb[0].mxu0 }
 0x130   :  { %506 = vst.msk [vmem:[%s1151_s5 + $0x10] sm:$0xff] %vm503_vm1, %v791_v50  ;;  %v440_v51 = vpop.f32.mrb[17].mxu1  ;;  %s934_s12 = smov [#allocation6]   ;;  %561 = vst [vmem:[#allocation6] sm:$0x3] %v555_v54  ;;  %v823_v55 = vpop.f32.mrb[1].mxu0 }
 0x131   :  { %504 = vst.msk [vmem:[%s1151_s5] sm:$0xff] %vm503_vm1, %v440_v51  ;;  %v792_v52 = vpop.f32.mrb[18].mxu1  ;;  %s582_s1 = sshll.u32 %s934_s12, 4  ;;  %v558_v57 = vpop.f32.mrb[2].mxu0  ;;  %s583_s1 = int_to_ptr.vmem [resolvable:$true] %s582_s1 }
 0x132   :  { %507 = vst.msk [vmem:[%s1151_s5 + $0x18] sm:$0xff] %vm503_vm1, %v792_v52  ;;  %v443_v53 = vpop.f32.mrb[19].mxu1  ;;  %s900_s8 = scalar_lea.vmem %s583_s1, 32  ;;  %p905_p3 = scmp.lt.s32.totalorder %s583_s1, %s583_s1 }
 0x133   :  { %505 = vst.msk [vmem:[%s1151_s5 + $0x8] sm:$0xff] %vm503_vm1, %v443_v53  ;;  %v795_v56 = vpop.f32.mrb[20].mxu1  ;;  %p901_p2 = scmp.ne.s32.totalorder %s583_s1, %s900_s8  ;;  %p906_p4 = scmp.lt.s32.totalorder %s900_s8, %s900_s8 }
 0x135   :  { %p907_p5 = por %p906_p4, %p905_p3 }
 0x137   :  { %p908_p6 = pnand %p907_p5, %p901_p2 }
 0x139   :  { %911 = shalt.err (!%p908_p6)
}
 0x13a   :  { %s912_s17 = scalar_lea.hbm %s1152_s6, 32 }
 0x13b   :  { %p913_p7 = scmp.ne.s32.totalorder %s1152_s6, %s912_s17  ;;  %p916_p8 = scmp.lt.u32.totalorder %s912_s17, %s1152_s6 }
 0x13d   :  { %p918_p9 = pnand %p916_p8, %p913_p7 }
 0x13f   :  { %921 = shalt.err (!%p918_p9)
}
 0x140   :  { %585 = dma.vmem_to_hbm [thread:$0]  %s583_s1, 32, %s1152_s6, [#allocation7]   ;;  %510 = vst.msk [vmem:[%s1151_s5 + $0x30] sm:$0xff] %vm503_vm1, %v795_v56  ;;  %v456_v58 = vpop.f32.mrb[21].mxu1  ;;  %v824_v59 = vpop.f32.mrb[3].mxu0 }
 0x141   :  { %508 = vst.msk [vmem:[%s1151_s5 + $0x20] sm:$0xff] %vm503_vm1, %v456_v58  ;;  %v796_v60 = vpop.f32.mrb[22].mxu1 }
 0x142   :  { %511 = vst.msk [vmem:[%s1151_s5 + $0x38] sm:$0xff] %vm503_vm1, %v796_v60  ;;  %v459_v61 = vpop.f32.mrb[23].mxu1 }
 0x143   :  { %509 = vst.msk [vmem:[%s1151_s5 + $0x28] sm:$0xff] %vm503_vm1, %v459_v61  ;;  %v799_v62 = vpop.f32.mrb[24].mxu1 }
 0x144   :  { %514 = vst.msk [vmem:[%s1151_s5 + $0x50] sm:$0xff] %vm503_vm1, %v799_v62  ;;  %v472_v63 = vpop.f32.mrb[25].mxu1 }
 0x145   :  { %512 = vst.msk [vmem:[%s1151_s5 + $0x40] sm:$0xff] %vm503_vm1, %v472_v63  ;;  %v800_v0 = vpop.f32.mrb[26].mxu1 }
 0x146   :  { %515 = vst.msk [vmem:[%s1151_s5 + $0x58] sm:$0xff] %vm503_vm1, %v800_v0  ;;  %v475_v1 = vpop.f32.mrb[27].mxu1 }
 0x147   :  { %513 = vst.msk [vmem:[%s1151_s5 + $0x48] sm:$0xff] %vm503_vm1, %v475_v1  ;;  %v803_v2 = vpop.f32.mrb[28].mxu1 }
 0x148   :  { %518 = vst.msk [vmem:[%s1151_s5 + $0x70] sm:$0xff] %vm503_vm1, %v803_v2  ;;  %v488_v3 = vpop.f32.mrb[29].mxu1 }
 0x149   :  { %516 = vst.msk [vmem:[%s1151_s5 + $0x60] sm:$0xff] %vm503_vm1, %v488_v3  ;;  %v804_v4 = vpop.f32.mrb[30].mxu1 }
 0x14a   :  { %519 = vst.msk [vmem:[%s1151_s5 + $0x78] sm:$0xff] %vm503_vm1, %v804_v4  ;;  %v491_v5 = vpop.f32.mrb[31].mxu1 }
 0x14b   :  { %517 = vst.msk [vmem:[%s1151_s5 + $0x68] sm:$0xff] %vm503_vm1, %v491_v5 }
 0x14c   :  { %924 = dma.done.wait [#allocation4], 1024  }
 0x14d   :  { %925 = vsyncadd [#allocation4], 4294966272 }
 0x14e   :  { %926 = dma.done.wait [#allocation7], 32  }
 0x14f   :  { %927 = vsyncadd [#allocation7], 4294967264 }
 0x150   :  { %594 = vsyncpa [#allocation3], 1 }
 0x151   :  { %595 = vsyncpa [#allocation4], 1 }
 0x152   :  { %596 = vsyncpa [#allocation7], 1 }

</bundles_post_ra>
